<compile_context>
chip_gen: v6e
topology: v6e:2x2x1
jax: 0.10.0
libtpu: 0.0.40
codegen_flags: <defaults>
</compile_context>

<pallas_src>
import functools

import jax
import jax.numpy as jnp
from jax import lax
from jax.experimental import pallas as pl
from jax.experimental.pallas import tpu as pltpu

BN_EPS = 1e-5
_LANE = 128
_SUBLANE = 8
_NEG_INF = float(jnp.finfo(jnp.float32).min)


# ---------------------------------------------------------------------------
# small helpers
# ---------------------------------------------------------------------------
def _round_up(x, m):
    return ((x + m - 1) // m) * m


def _same_pad(size, k, s):
    out = -(-size // s)
    pad = max((out - 1) * s + k - size, 0)
    return pad // 2, pad - pad // 2


def _const_spec(shape):
    nd = len(shape)
    return pl.BlockSpec(tuple(shape), lambda *_, nd=nd: (0,) * nd)


def _vmem_budget():
    """(tile-sizing budget, vmem_limit_bytes), generation-aware (v7x: 64 MiB/TC; v5e/v6e: 128 MiB)."""
    try:
        cap = int(pltpu.get_tpu_info().vmem_capacity_bytes)
    except Exception:                       # no hw info at trace time -> assume smallest (v7x)
        cap = 64 * 1024 * 1024
    budget = cap // 2                       # leave headroom for compiler temporaries
    limit = min((cap * 3) // 4, 100 * 1024 * 1024)
    return budget, limit


def _pick_tile_hw(hw, per_row_bytes, budget):
    """HW tile: multiple of 128 lanes, sized from the VMEM budget, >=512 rows when possible."""
    cap_rows = max(_LANE, (budget // max(per_row_bytes, 1)) // _LANE * _LANE)
    tile = min(cap_rows, 4096, _round_up(hw, _LANE))
    if hw >= 512:                           # tiny-K matmuls are fill/drain bound: keep M long
        tile = max(tile, min(512, cap_rows))
    return tile


# ---------------------------------------------------------------------------
# wrapper-side im2col for the 3x3 / stride-2 / TF-"same" stem conv
# ---------------------------------------------------------------------------
def _im2col_stride2_3x3(image_nchw, ho, wo):
    """NCHW f32 image -> (N, Ho*Wo, 9*Cin) bf16 patch matrix (TF-'same' padding)."""
    n, cin, h, w = image_nchw.shape
    pt, pb = _same_pad(h, 3, 2)
    pleft, pright = _same_pad(w, 3, 2)
    x = jnp.transpose(image_nchw, (0, 2, 3, 1)).astype(jnp.bfloat16)       # NHWC, bf16
    xp = jnp.pad(x, ((0, 0), (pt, pb), (pleft, pright), (0, 0)))           # (N, 2Ho+1, 2Wo+1, Cin)
    taps = []
    for kh in range(3):
        for kw in range(3):
            taps.append(lax.slice(xp,
                                  (0, kh, kw, 0),
                                  (n, kh + 2 * (ho - 1) + 1, kw + 2 * (wo - 1) + 1, cin),
                                  (1, 2, 2, 1)))                           # (N, Ho, Wo, Cin)
    patches = jnp.concatenate(taps, axis=-1)                               # (N, Ho, Wo, 9*Cin)
    return patches.reshape(n, ho * wo, 9 * cin)


# ---------------------------------------------------------------------------
# Stem conv + avg/max pooling, fused: one MXU dot per HW tile + running reductions
# ---------------------------------------------------------------------------
def _make_stem_pool_kernel(tile_hw, kc, c_pad, cout_pad, hw, hw_pad):
    inv_hw = 1.0 / float(hw)
    need_mask = hw_pad > hw

    def kernel(p_ref, w_ref, feat_ref, avg_ref, max_ref):
        t = pl.program_id(1)

        x = p_ref[...].reshape(tile_hw, kc)                                 # (tile_hw, 9*Cin) bf16
        y = jnp.dot(x, w_ref[...], preferred_element_type=jnp.float32)     # (tile_hw, c_pad) f32

        # features, channel-major with HW on lanes (lane-dense vst, NCHW is a free reshape)
        yt = y.T                                                            # (c_pad, tile_hw) via XLU
        feat_ref[...] = yt[:cout_pad].reshape(1, cout_pad, tile_hw)

        @pl.when(t == 0)
        def _init():
            avg_ref[...] = jnp.zeros_like(avg_ref)
            max_ref[...] = jnp.full_like(max_ref, _NEG_INF)

        if need_mask:                                                       # mask padded HW rows (max only;
            row = t * tile_hw + lax.broadcasted_iota(jnp.int32, (tile_hw, c_pad), 0)
            y_max = jnp.where(row < hw, y, _NEG_INF)                        # padded rows are zero for the sum)
        else:
            y_max = y

        avg_ref[...] = avg_ref[...] + jnp.sum(y, axis=0, keepdims=True).reshape(1, 1, c_pad)
        max_ref[...] = jnp.maximum(max_ref[...],
                                   jnp.max(y_max, axis=0, keepdims=True).reshape(1, 1, c_pad))

        @pl.when(t == pl.num_programs(1) - 1)
        def _finalize():
            avg_ref[...] = avg_ref[...] * inv_hw

    return kernel


def pallas_stem_pool(patches, w, hw, hw_pad, tile_hw, c_pad, cout_pad, vmem_limit):
    n = patches.shape[0]
    kc = patches.shape[-1]
    grid_t = hw_pad // tile_hw
    kernel = _make_stem_pool_kernel(tile_hw, kc, c_pad, cout_pad, hw, hw_pad)
    return pl.pallas_call(
        kernel,
        out_shape=(jax.ShapeDtypeStruct((n, cout_pad, hw_pad), jnp.float32),   # features (C-major)
                   jax.ShapeDtypeStruct((n, 1, c_pad), jnp.float32),           # avg pool
                   jax.ShapeDtypeStruct((n, 1, c_pad), jnp.float32)),          # max pool
        grid=(n, grid_t),
        in_specs=[pl.BlockSpec((1, tile_hw, kc), lambda b, t: (b, t, 0)),
                  pl.BlockSpec((kc, c_pad), lambda b, t: (0, 0))],
        out_specs=(pl.BlockSpec((1, cout_pad, tile_hw), lambda b, t: (b, 0, t)),
                   pl.BlockSpec((1, 1, c_pad), lambda b, t: (b, 0, 0)),
                   pl.BlockSpec((1, 1, c_pad), lambda b, t: (b, 0, 0))),
        compiler_params=pltpu.CompilerParams(
            dimension_semantics=("parallel", "arbitrary"),    # batch shardable on v7x megacore
            vmem_limit_bytes=vmem_limit),
    )(patches, w)


# ---------------------------------------------------------------------------
# Head: BN1 -> Linear(2C,512) -> ReLU -> BN2 -> Linear(512, classes), one tiny kernel
# ---------------------------------------------------------------------------
def _make_head_kernel():
    def kernel(avg_ref, max_ref, bn1_ref, w1a_ref, w1m_ref, misc_ref,
               w2_ref, lb_ref, logits_ref, feat_ref):
        bn1 = bn1_ref[...]                    # rows: g_a, b_a, m_a, v_a, g_m, b_m, m_m, v_m
        misc = misc_ref[...]                  # rows: fc_b, g2, b2, m2, v2, 0, 0, 0
        xa = (avg_ref[...] - bn1[2:3]) * lax.rsqrt(bn1[3:4] + BN_EPS) * bn1[0:1] + bn1[1:2]
        xm = (max_ref[...] - bn1[6:7]) * lax.rsqrt(bn1[7:8] + BN_EPS) * bn1[4:5] + bn1[5:6]
        # Linear(2C, 512) as two half-K dots (avoids a cross-lane concat of [avg, max])
        h = (jnp.dot(xa.astype(jnp.bfloat16), w1a_ref[...], preferred_element_type=jnp.float32)
             + jnp.dot(xm.astype(jnp.bfloat16), w1m_ref[...], preferred_element_type=jnp.float32)
             + misc[0:1])
        h = jnp.maximum(h, 0.0)                                             # ReLU
        h = (h - misc[3:4]) * lax.rsqrt(misc[4:5] + BN_EPS) * misc[1:2] + misc[2:3]
        feat_ref[...] = h                                                   # feature_vector
        logits_ref[...] = (jnp.dot(h.astype(jnp.bfloat16), w2_ref[...],
                                   preferred_element_type=jnp.float32)
                           + lb_ref[...])
    return kernel


def pallas_head(avg, mx, pp, vmem_limit):
    n_sub = avg.shape[0]
    nc_pad = pp["logit_w"].shape[1]
    ins = (avg, mx, pp["bn1"], pp["fc_w_avg"], pp["fc_w_max"], pp["misc"],
           pp["logit_w"], pp["logit_b"])
    return pl.pallas_call(
        _make_head_kernel(),
        out_shape=(jax.ShapeDtypeStruct((n_sub, nc_pad), jnp.float32),
                   jax.ShapeDtypeStruct((n_sub, 512), jnp.float32)),
        grid=(1,),
        in_specs=[_const_spec(a.shape) for a in ins],
        out_specs=(_const_spec((n_sub, nc_pad)), _const_spec((n_sub, 512))),
        compiler_params=pltpu.CompilerParams(
            dimension_semantics=("arbitrary",),
            vmem_limit_bytes=vmem_limit),
    )(*ins)


# ---------------------------------------------------------------------------
# Parameter construction (deterministic, synthetic) + packed/lane-padded head params
# ---------------------------------------------------------------------------
def make_params(key, in_channels, stem_out_channels, num_classes):
    keys = jax.random.split(key, 12)
    # base stem weight for 3 input channels (out, in=3, 3, 3)
    w0 = jax.random.normal(keys[0], (stem_out_channels, 3, 3, 3), jnp.float32) * 0.1
    # __init__: torch.cat([w]*(Cin//3) + [w[:, :Cin%3, :, :]], dim=1)
    reps = [w0] * (in_channels // 3)
    if in_channels % 3:
        reps = reps + [w0[:, : in_channels % 3, :, :]]
    stem_w = jnp.concatenate(reps, axis=1)                            # (Cout, Cin, 3, 3)

    c2 = stem_out_channels * 2                                        # head in_channels
    return {
        "stem_w": stem_w,
        "bn1_gamma": jax.random.uniform(keys[1], (1, c2), jnp.float32, 0.5, 1.5),
        "bn1_beta": jax.random.normal(keys[2], (1, c2), jnp.float32) * 0.1,
        "bn1_mean": jax.random.normal(keys[3], (1, c2), jnp.float32) * 0.1,
        "bn1_var": jax.random.uniform(keys[4], (1, c2), jnp.float32, 0.5, 1.5),
        "fc_w": jax.random.normal(keys[5], (c2, 512), jnp.float32) * 0.05,
        "fc_b": jax.random.normal(keys[6], (1, 512), jnp.float32) * 0.05,
        "bn2_gamma": jax.random.uniform(keys[7], (1, 512), jnp.float32, 0.5, 1.5),
        "bn2_beta": jax.random.normal(keys[8], (1, 512), jnp.float32) * 0.1,
        "bn2_mean": jax.random.normal(keys[9], (1, 512), jnp.float32) * 0.1,
        "bn2_var": jax.random.uniform(keys[10], (1, 512), jnp.float32, 0.5, 1.5),
        "logit_w": jax.random.normal(keys[11], (512, num_classes), jnp.float32) * 0.05,
        "logit_b": jnp.zeros((1, num_classes), jnp.float32),
    }


def _prepare_head_params(params, cout, c_pad, num_classes):
    """Split 2C head params into avg/max halves, lane-pad, stack BN vectors, bf16 MXU weights."""
    pad_c = c_pad - cout
    nc_pad = _round_up(num_classes, _LANE)

    def split_pad(vec, pad_value):
        a, m = vec[:, :cout], vec[:, cout:]
        a = jnp.pad(a, ((0, 0), (0, pad_c)), constant_values=pad_value)
        m = jnp.pad(m, ((0, 0), (0, pad_c)), constant_values=pad_value)
        return a, m

    g_a, g_m = split_pad(params["bn1_gamma"], 1.0)
    b_a, b_m = split_pad(params["bn1_beta"], 0.0)
    m_a, m_m = split_pad(params["bn1_mean"], 0.0)
    v_a, v_m = split_pad(params["bn1_var"], 1.0)
    bn1 = jnp.concatenate([g_a, b_a, m_a, v_a, g_m, b_m, m_m, v_m], axis=0)     # (8, c_pad)

    fc_w = params["fc_w"]                                                       # (2C, 512)
    w_a = jnp.pad(fc_w[:cout], ((0, pad_c), (0, 0))).astype(jnp.bfloat16)       # (c_pad, 512)
    w_m = jnp.pad(fc_w[cout:], ((0, pad_c), (0, 0))).astype(jnp.bfloat16)

    misc = jnp.concatenate([params["fc_b"], params["bn2_gamma"], params["bn2_beta"],
                            params["bn2_mean"], params["bn2_var"],
                            jnp.zeros((3, 512), jnp.float32)], axis=0)          # (8, 512)

    logit_w = jnp.pad(params["logit_w"],
                      ((0, 0), (0, nc_pad - num_classes))).astype(jnp.bfloat16)
    logit_b = jnp.pad(params["logit_b"], ((0, 0), (0, nc_pad - num_classes)))

    return {"bn1": bn1, "fc_w_avg": w_a, "fc_w_max": w_m, "misc": misc,
            "logit_w": logit_w, "logit_b": logit_b}


# ---------------------------------------------------------------------------
# Full forward (mirrors EfficientnetClsNet.forward, eval mode, att_type=None, do_ml=False)
# ---------------------------------------------------------------------------
@functools.partial(jax.jit, static_argnames=("num_classes",))
def efficientnet_cls_forward(image_nchw, params, num_classes):
    n = image_nchw.shape[0]
    h, w_sz = image_nchw.shape[2], image_nchw.shape[3]
    stem_w = params["stem_w"]
    cout = stem_w.shape[0]
    cout_pad = _round_up(cout, _SUBLANE)
    c_pad = _round_up(cout, _LANE)
    ho, wo = -(-h // 2), -(-w_sz // 2)
    hw = ho * wo

    # im2col (stride-2 reuse: ~2.25x image bytes); single fused MXU dot per tile in-kernel
    patches = _im2col_stride2_3x3(image_nchw, ho, wo)                    # (N, HW, 9*Cin) bf16
    kc = patches.shape[-1]

    # (Cout, Cin, 3, 3) -> (9*Cin, c_pad), zero-padded output lanes, bf16
    w = jnp.transpose(stem_w, (2, 3, 1, 0)).reshape(kc, cout)
    w = jnp.pad(w, ((0, 0), (0, c_pad - cout))).astype(jnp.bfloat16)

    budget, vmem_limit = _vmem_budget()
    per_row = (2 * 2 * _round_up(kc, _LANE)          # patches (bf16, double-buffered, lane-padded VMEM)
               + 2 * 4 * cout_pad                    # features out (f32, double-buffered)
               + 3 * 4 * c_pad)                      # f32 matmul result + transpose + headroom
    tile_hw = _pick_tile_hw(hw, per_row, budget)
    hw_pad = _round_up(hw, tile_hw)
    if hw_pad > hw:
        patches = jnp.pad(patches, ((0, 0), (0, hw_pad - hw), (0, 0)))

    feat_cmajor, pooled_avg, pooled_max = pallas_stem_pool(
        patches, w, hw, hw_pad, tile_hw, c_pad, cout_pad, vmem_limit)

    # features in NCHW for PyTorch parity — just a reshape (kernel already wrote channel-major)
    features = feat_cmajor[:, :cout, :hw].reshape(n, cout, ho, wo)

    # head: pooled vectors only (HW reduction already fused into the stem kernel)
    n_sub = _round_up(max(n, 1), _SUBLANE)
    avg = jnp.pad(pooled_avg.reshape(n, c_pad), ((0, n_sub - n), (0, 0)))
    mx = jnp.pad(pooled_max.reshape(n, c_pad), ((0, n_sub - n), (0, 0)))

    pp = _prepare_head_params(params, cout, c_pad, num_classes)
    logits_p, fvec_p = pallas_head(avg, mx, pp, vmem_limit)

    return {"logits": logits_p[:n, :num_classes],
            "features": features,
            "feature_vector": fvec_p[:n, :]}


# ---------------------------------------------------------------------------
# Pure-JAX reference (same numerics: bf16 MXU operands, f32 accumulation)
# ---------------------------------------------------------------------------
def reference_forward(image_nchw, params):
    _, _, h, w_sz = image_nchw.shape
    pt, pb = _same_pad(h, 3, 2)
    pleft, pright = _same_pad(w_sz, 3, 2)
    feat = lax.conv_general_dilated(
        image_nchw.astype(jnp.bfloat16), params["stem_w"].astype(jnp.bfloat16),
        window_strides=(2, 2), padding=[(pt, pb), (pleft, pright)],
        dimension_numbers=("NCHW", "OIHW", "NCHW"),
        preferred_element_type=jnp.float32)                              # (N, Cout, Ho, Wo)
    avg = jnp.mean(feat, axis=(2, 3))
    mx = jnp.max(feat, axis=(2, 3))
    x = jnp.concatenate([avg, mx], axis=1)
    x = (x - params["bn1_mean"]) * lax.rsqrt(params["bn1_var"] + BN_EPS) * params["bn1_gamma"] + params["bn1_beta"]
    x = jnp.dot(x.astype(jnp.bfloat16), params["fc_w"].astype(jnp.bfloat16),
                preferred_element_type=jnp.float32) + params["fc_b"]
    x = jnp.maximum(x, 0.0)
    x = (x - params["bn2_mean"]) * lax.rsqrt(params["bn2_var"] + BN_EPS) * params["bn2_gamma"] + params["bn2_beta"]
    logits = jnp.dot(x.astype(jnp.bfloat16), params["logit_w"].astype(jnp.bfloat16),
                     preferred_element_type=jnp.float32) + params["logit_b"]
    return logits, x, feat


if __name__ == "__main__":
    # small synthetic config consistent with the module's forward
    batch, in_channels, H, W = 2, 4, 16, 16
    stem_out_channels = 16          # stand-in for backbone._conv_head.out_channels
    num_classes = 10

    key = jax.random.PRNGKey(0)
    k_img, k_par = jax.random.split(key)
    image = jax.random.normal(k_img, (batch, in_channels, H, W), jnp.float32)   # NCHW input
    params = make_params(k_par, in_channels, stem_out_channels, num_classes)

    out = efficientnet_cls_forward(image, params, num_classes)
    jax.block_until_ready(out)

    assert out["logits"].shape == (batch, num_classes)
    assert out["feature_vector"].shape == (batch, 512)
    assert out["features"].shape == (batch, stem_out_channels, H // 2, W // 2)

    # correctness check vs pure-JAX reference (bf16 operands, f32 accumulation in both paths)
    ref_logits, ref_fvec, ref_features = reference_forward(image, params)
    assert float(jnp.max(jnp.abs(out["features"] - ref_features))) < 1e-2
    assert float(jnp.max(jnp.abs(out["feature_vector"] - ref_fvec))) < 3e-2
    assert float(jnp.max(jnp.abs(out["logits"] - ref_logits))) < 3e-2

    print("KERNEL_OK")
</pallas_src>

<mosaic_0001>
module attributes {stable_mosaic.version = 11 : i64} {
  func.func @kernel(%arg0: i32, %arg1: i32, %arg2: memref<1x128x36xbf16, #tpu.memory_space<vmem>>, %arg3: memref<36x128xbf16, #tpu.memory_space<vmem>>, %arg4: memref<1x16x128xf32, #tpu.memory_space<vmem>>, %arg5: memref<1x1x128xf32, #tpu.memory_space<vmem>>, %arg6: memref<1x1x128xf32, #tpu.memory_space<vmem>>) attributes {dimension_semantics = [#tpu.dimension_semantics<parallel>, #tpu.dimension_semantics<arbitrary>], iteration_bounds = array<i64: 2, 1>, scalar_prefetch = 0 : i64, scratch_operands = 0 : i64, tpu.core_type = #tpu.core_type<tc>, window_params = [{transform_indices = @transform_0, window_bounds = array<i64: 1, 128, 36>}, {pipeline_mode = #tpu.pipeline_mode<synchronous>, transform_indices = @transform_1, window_bounds = array<i64: 36, 128>}, {transform_indices = @transform_2, window_bounds = array<i64: 1, 16, 128>}, {transform_indices = @transform_3, window_bounds = array<i64: 1, 1, 128>}, {transform_indices = @transform_4, window_bounds = array<i64: 1, 1, 128>}]} {
    %c0 = arith.constant 0 : index
    %c0_0 = arith.constant 0 : index
    %c0_1 = arith.constant 0 : index
    %0 = vector.load %arg2[%c0, %c0_0, %c0_1] : memref<1x128x36xbf16, #tpu.memory_space<vmem>>, vector<1x128x36xbf16>
    %1 = vector.shape_cast %0 : vector<1x128x36xbf16> to vector<128x36xbf16>
    %c0_2 = arith.constant 0 : index
    %c0_3 = arith.constant 0 : index
    %2 = vector.load %arg3[%c0_2, %c0_3] : memref<36x128xbf16, #tpu.memory_space<vmem>>, vector<36x128xbf16>
    %cst = arith.constant dense<0.000000e+00> : vector<128x128xf32>
    %3 = tpu.matmul %1, %2, %cst {dimension_numbers = #tpu.dot_dimension_numbers<[1], [0], [0], [1], [0, 0, 1, 1], [], []>} : vector<128x36xbf16>, vector<36x128xbf16>, vector<128x128xf32> -> vector<128x128xf32>
    %4 = tpu.transpose %3, [1, 0] : vector<128x128xf32> -> vector<128x128xf32>
    %5 = vector.extract_strided_slice %4 {offsets = [0, 0], sizes = [16, 128], strides = [1, 1]} : vector<128x128xf32> to vector<16x128xf32>
    %6 = vector.shape_cast %5 : vector<16x128xf32> to vector<1x16x128xf32>
    %c0_4 = arith.constant 0 : index
    %c0_5 = arith.constant 0 : index
    %c0_6 = arith.constant 0 : index
    %7 = vector.load %arg4[%c0_4, %c0_5, %c0_6] : memref<1x16x128xf32, #tpu.memory_space<vmem>>, vector<1x16x128xf32>
    tpu.vector_store %arg4[%c0_4, %c0_5, %c0_6], %6 {strides = array<i32>} : memref<1x16x128xf32, #tpu.memory_space<vmem>>, vector<1x16x128xf32>,
    %c0_i32 = arith.constant 0 : i32
    %8 = arith.cmpi eq, %arg1, %c0_i32 : i32
    %9 = arith.extui %8 : i1 to i32
    %c0_i32_7 = arith.constant 0 : i32
    %10 = arith.cmpi ne, %9, %c0_i32_7 : i32
    scf.if %10 {
      %cst_25 = arith.constant 0.000000e+00 : f32
      %34 = vector.broadcast %cst_25 : f32 to vector<1x1x128xf32>
      %c0_26 = arith.constant 0 : index
      %c0_27 = arith.constant 0 : index
      %c0_28 = arith.constant 0 : index
      %35 = vector.load %arg5[%c0_26, %c0_27, %c0_28] : memref<1x1x128xf32, #tpu.memory_space<vmem>>, vector<1x1x128xf32>
      tpu.vector_store %arg5[%c0_26, %c0_27, %c0_28], %34 {strides = array<i32>} : memref<1x1x128xf32, #tpu.memory_space<vmem>>, vector<1x1x128xf32>,
      %cst_29 = arith.constant -3.40282347E+38 : f32
      %36 = vector.broadcast %cst_29 : f32 to vector<1x1x128xf32>
      %c0_30 = arith.constant 0 : index
      %c0_31 = arith.constant 0 : index
      %c0_32 = arith.constant 0 : index
      %37 = vector.load %arg6[%c0_30, %c0_31, %c0_32] : memref<1x1x128xf32, #tpu.memory_space<vmem>>, vector<1x1x128xf32>
      tpu.vector_store %arg6[%c0_30, %c0_31, %c0_32], %36 {strides = array<i32>} : memref<1x1x128xf32, #tpu.memory_space<vmem>>, vector<1x1x128xf32>,
    } else {
    }
    %c128_i32 = arith.constant 128 : i32
    %11 = arith.muli %arg1, %c128_i32 : i32
    %12 = tpu.iota {dimensions = array<i32: 0>} : vector<128x128xi32>
    %13 = vector.broadcast %11 : i32 to vector<128x128xi32>
    %14 = arith.addi %13, %12 : vector<128x128xi32>
    %c64_i32 = arith.constant 64 : i32
    %15 = vector.broadcast %c64_i32 : i32 to vector<128x128xi32>
    %16 = arith.cmpi slt, %14, %15 : vector<128x128xi32>
    %cst_8 = arith.constant -3.40282347E+38 : f32
    %17 = vector.broadcast %cst_8 : f32 to vector<128x128xf32>
    %18 = arith.select %16, %3, %17 : vector<128x128xi1>, vector<128x128xf32>
    %c0_9 = arith.constant 0 : index
    %c0_10 = arith.constant 0 : index
    %c0_11 = arith.constant 0 : index
    %19 = vector.load %arg5[%c0_9, %c0_10, %c0_11] : memref<1x1x128xf32, #tpu.memory_space<vmem>>, vector<1x1x128xf32>
    %cst_12 = arith.constant dense<0.000000e+00> : vector<128xf32>
    %20 = vector.multi_reduction <add>, %3, %cst_12 [0] : vector<128x128xf32> to vector<128xf32>
    %21 = vector.shape_cast %20 : vector<128xf32> to vector<1x128xf32>
    %22 = vector.shape_cast %21 : vector<1x128xf32> to vector<1x1x128xf32>
    %23 = arith.addf %19, %22 : vector<1x1x128xf32>
    %c0_13 = arith.constant 0 : index
    %c0_14 = arith.constant 0 : index
    %c0_15 = arith.constant 0 : index
    %24 = vector.load %arg5[%c0_13, %c0_14, %c0_15] : memref<1x1x128xf32, #tpu.memory_space<vmem>>, vector<1x1x128xf32>
    tpu.vector_store %arg5[%c0_13, %c0_14, %c0_15], %23 {strides = array<i32>} : memref<1x1x128xf32, #tpu.memory_space<vmem>>, vector<1x1x128xf32>,
    %c0_16 = arith.constant 0 : index
    %c0_17 = arith.constant 0 : index
    %c0_18 = arith.constant 0 : index
    %25 = vector.load %arg6[%c0_16, %c0_17, %c0_18] : memref<1x1x128xf32, #tpu.memory_space<vmem>>, vector<1x1x128xf32>
    %cst_19 = arith.constant dense<0xFF800000> : vector<128xf32>
    %26 = vector.multi_reduction <maximumf>, %18, %cst_19 [0] : vector<128x128xf32> to vector<128xf32>
    %27 = vector.shape_cast %26 : vector<128xf32> to vector<1x128xf32>
    %28 = vector.shape_cast %27 : vector<1x128xf32> to vector<1x1x128xf32>
    %29 = arith.maximumf %25, %28 : vector<1x1x128xf32>
    %c0_20 = arith.constant 0 : index
    %c0_21 = arith.constant 0 : index
    %c0_22 = arith.constant 0 : index
    %30 = vector.load %arg6[%c0_20, %c0_21, %c0_22] : memref<1x1x128xf32, #tpu.memory_space<vmem>>, vector<1x1x128xf32>
    tpu.vector_store %arg6[%c0_20, %c0_21, %c0_22], %29 {strides = array<i32>} : memref<1x1x128xf32, #tpu.memory_space<vmem>>, vector<1x1x128xf32>,
    %c0_i32_23 = arith.constant 0 : i32
    %31 = arith.cmpi eq, %arg1, %c0_i32_23 : i32
    %32 = arith.extui %31 : i1 to i32
    %c0_i32_24 = arith.constant 0 : i32
    %33 = arith.cmpi ne, %32, %c0_i32_24 : i32
    scf.if %33 {
      %c0_25 = arith.constant 0 : index
      %c0_26 = arith.constant 0 : index
      %c0_27 = arith.constant 0 : index
      %34 = vector.load %arg5[%c0_25, %c0_26, %c0_27] : memref<1x1x128xf32, #tpu.memory_space<vmem>>, vector<1x1x128xf32>
      %cst_28 = arith.constant 1.562500e-02 : f32
      %35 = vector.broadcast %cst_28 : f32 to vector<1x1x128xf32>
      %36 = arith.mulf %34, %35 : vector<1x1x128xf32>
      %c0_29 = arith.constant 0 : index
      %c0_30 = arith.constant 0 : index
      %c0_31 = arith.constant 0 : index
      %37 = vector.load %arg5[%c0_29, %c0_30, %c0_31] : memref<1x1x128xf32, #tpu.memory_space<vmem>>, vector<1x1x128xf32>
      tpu.vector_store %arg5[%c0_29, %c0_30, %c0_31], %36 {strides = array<i32>} : memref<1x1x128xf32, #tpu.memory_space<vmem>>, vector<1x1x128xf32>,
    } else {
    }
    return
  }
  func.func @transform_0(%arg0: i32, %arg1: i32) -> (i32, i32, i32) {
    %c0_i32 = arith.constant 0 : i32
    %c0_i32_0 = arith.constant 0 : i32
    return %arg0, %arg1, %c0_i32 : i32, i32, i32
  }
  func.func @transform_1(%arg0: i32, %arg1: i32) -> (i32, i32) {
    %c0_i32 = arith.constant 0 : i32
    %c0_i32_0 = arith.constant 0 : i32
    %c0_i32_1 = arith.constant 0 : i32
    return %c0_i32, %c0_i32_0 : i32, i32
  }
  func.func @transform_2(%arg0: i32, %arg1: i32) -> (i32, i32, i32) {
    %c0_i32 = arith.constant 0 : i32
    %c0_i32_0 = arith.constant 0 : i32
    return %arg0, %c0_i32, %arg1 : i32, i32, i32
  }
  func.func @transform_3(%arg0: i32, %arg1: i32) -> (i32, i32, i32) {
    %c0_i32 = arith.constant 0 : i32
    %c0_i32_0 = arith.constant 0 : i32
    %c0_i32_1 = arith.constant 0 : i32
    return %arg0, %c0_i32, %c0_i32_0 : i32, i32, i32
  }
  func.func @transform_4(%arg0: i32, %arg1: i32) -> (i32, i32, i32) {
    %c0_i32 = arith.constant 0 : i32
    %c0_i32_0 = arith.constant 0 : i32
    %c0_i32_1 = arith.constant 0 : i32
    return %arg0, %c0_i32, %c0_i32_0 : i32, i32, i32
  }
}

module attributes {stable_mosaic.version = 11 : i64} {
  func.func @kernel(%arg0: i32, %arg1: memref<8x128xf32, #tpu.memory_space<vmem>>, %arg2: memref<8x128xf32, #tpu.memory_space<vmem>>, %arg3: memref<8x128xf32, #tpu.memory_space<vmem>>, %arg4: memref<128x512xbf16, #tpu.memory_space<vmem>>, %arg5: memref<128x512xbf16, #tpu.memory_space<vmem>>, %arg6: memref<8x512xf32, #tpu.memory_space<vmem>>, %arg7: memref<512x128xbf16, #tpu.memory_space<vmem>>, %arg8: memref<1x128xf32, #tpu.memory_space<vmem>>, %arg9: memref<8x128xf32, #tpu.memory_space<vmem>>, %arg10: memref<8x512xf32, #tpu.memory_space<vmem>>) attributes {dimension_semantics = [#tpu.dimension_semantics<arbitrary>], iteration_bounds = array<i64: 1>, scalar_prefetch = 0 : i64, scratch_operands = 0 : i64, tpu.core_type = #tpu.core_type<tc>, window_params = [{pipeline_mode = #tpu.pipeline_mode<synchronous>, transform_indices = @transform_0, window_bounds = array<i64: 8, 128>}, {pipeline_mode = #tpu.pipeline_mode<synchronous>, transform_indices = @transform_1, window_bounds = array<i64: 8, 128>}, {pipeline_mode = #tpu.pipeline_mode<synchronous>, transform_indices = @transform_2, window_bounds = array<i64: 8, 128>}, {pipeline_mode = #tpu.pipeline_mode<synchronous>, transform_indices = @transform_3, window_bounds = array<i64: 128, 512>}, {pipeline_mode = #tpu.pipeline_mode<synchronous>, transform_indices = @transform_4, window_bounds = array<i64: 128, 512>}, {pipeline_mode = #tpu.pipeline_mode<synchronous>, transform_indices = @transform_5, window_bounds = array<i64: 8, 512>}, {pipeline_mode = #tpu.pipeline_mode<synchronous>, transform_indices = @transform_6, window_bounds = array<i64: 512, 128>}, {pipeline_mode = #tpu.pipeline_mode<synchronous>, transform_indices = @transform_7, window_bounds = array<i64: 1, 128>}, {pipeline_mode = #tpu.pipeline_mode<synchronous>, transform_indices = @transform_8, window_bounds = array<i64: 8, 128>}, {pipeline_mode = #tpu.pipeline_mode<synchronous>, transform_indices = @transform_9, window_bounds = array<i64: 8, 512>}]} {
    %c0 = arith.constant 0 : index
    %c0_0 = arith.constant 0 : index
    %0 = vector.load %arg3[%c0, %c0_0] : memref<8x128xf32, #tpu.memory_space<vmem>>, vector<8x128xf32>
    %c0_1 = arith.constant 0 : index
    %c0_2 = arith.constant 0 : index
    %1 = vector.load %arg6[%c0_1, %c0_2] : memref<8x512xf32, #tpu.memory_space<vmem>>, vector<8x512xf32>
    %c0_3 = arith.constant 0 : index
    %c0_4 = arith.constant 0 : index
    %2 = vector.load %arg1[%c0_3, %c0_4] : memref<8x128xf32, #tpu.memory_space<vmem>>, vector<8x128xf32>
    %3 = vector.extract_strided_slice %0 {offsets = [2, 0], sizes = [1, 128], strides = [1, 1]} : vector<8x128xf32> to vector<1x128xf32>
    %4 = vector.broadcast %3 : vector<1x128xf32> to vector<8x128xf32>
    %5 = arith.subf %2, %4 : vector<8x128xf32>
    %6 = vector.extract_strided_slice %0 {offsets = [3, 0], sizes = [1, 128], strides = [1, 1]} : vector<8x128xf32> to vector<1x128xf32>
    %cst = arith.constant 9.99999974E-6 : f32
    %7 = vector.broadcast %cst : f32 to vector<1x128xf32>
    %8 = arith.addf %6, %7 : vector<1x128xf32>
    %9 = math.rsqrt %8 : vector<1x128xf32>
    %10 = vector.broadcast %9 : vector<1x128xf32> to vector<8x128xf32>
    %11 = arith.mulf %5, %10 : vector<8x128xf32>
    %12 = vector.extract_strided_slice %0 {offsets = [0, 0], sizes = [1, 128], strides = [1, 1]} : vector<8x128xf32> to vector<1x128xf32>
    %13 = vector.broadcast %12 : vector<1x128xf32> to vector<8x128xf32>
    %14 = arith.mulf %11, %13 : vector<8x128xf32>
    %15 = vector.extract_strided_slice %0 {offsets = [1, 0], sizes = [1, 128], strides = [1, 1]} : vector<8x128xf32> to vector<1x128xf32>
    %16 = vector.broadcast %15 : vector<1x128xf32> to vector<8x128xf32>
    %17 = arith.addf %14, %16 : vector<8x128xf32>
    %c0_5 = arith.constant 0 : index
    %c0_6 = arith.constant 0 : index
    %18 = vector.load %arg2[%c0_5, %c0_6] : memref<8x128xf32, #tpu.memory_space<vmem>>, vector<8x128xf32>
    %19 = vector.extract_strided_slice %0 {offsets = [6, 0], sizes = [1, 128], strides = [1, 1]} : vector<8x128xf32> to vector<1x128xf32>
    %20 = vector.broadcast %19 : vector<1x128xf32> to vector<8x128xf32>
    %21 = arith.subf %18, %20 : vector<8x128xf32>
    %22 = vector.extract_strided_slice %0 {offsets = [7, 0], sizes = [1, 128], strides = [1, 1]} : vector<8x128xf32> to vector<1x128xf32>
    %cst_7 = arith.constant 9.99999974E-6 : f32
    %23 = vector.broadcast %cst_7 : f32 to vector<1x128xf32>
    %24 = arith.addf %22, %23 : vector<1x128xf32>
    %25 = math.rsqrt %24 : vector<1x128xf32>
    %26 = vector.broadcast %25 : vector<1x128xf32> to vector<8x128xf32>
    %27 = arith.mulf %21, %26 : vector<8x128xf32>
    %28 = vector.extract_strided_slice %0 {offsets = [4, 0], sizes = [1, 128], strides = [1, 1]} : vector<8x128xf32> to vector<1x128xf32>
    %29 = vector.broadcast %28 : vector<1x128xf32> to vector<8x128xf32>
    %30 = arith.mulf %27, %29 : vector<8x128xf32>
    %31 = vector.extract_strided_slice %0 {offsets = [5, 0], sizes = [1, 128], strides = [1, 1]} : vector<8x128xf32> to vector<1x128xf32>
    %32 = vector.broadcast %31 : vector<1x128xf32> to vector<8x128xf32>
    %33 = arith.addf %30, %32 : vector<8x128xf32>
    %34 = arith.truncf %17 : vector<8x128xf32> to vector<8x128xbf16>
    %c0_8 = arith.constant 0 : index
    %c0_9 = arith.constant 0 : index
    %35 = vector.load %arg4[%c0_8, %c0_9] : memref<128x512xbf16, #tpu.memory_space<vmem>>, vector<128x512xbf16>
    %cst_10 = arith.constant dense<0.000000e+00> : vector<8x512xf32>
    %36 = tpu.matmul %34, %35, %cst_10 {dimension_numbers = #tpu.dot_dimension_numbers<[1], [0], [0], [1], [0, 0, 1, 1], [], []>} : vector<8x128xbf16>, vector<128x512xbf16>, vector<8x512xf32> -> vector<8x512xf32>
    %37 = arith.truncf %33 : vector<8x128xf32> to vector<8x128xbf16>
    %c0_11 = arith.constant 0 : index
    %c0_12 = arith.constant 0 : index
    %38 = vector.load %arg5[%c0_11, %c0_12] : memref<128x512xbf16, #tpu.memory_space<vmem>>, vector<128x512xbf16>
    %cst_13 = arith.constant dense<0.000000e+00> : vector<8x512xf32>
    %39 = tpu.matmul %37, %38, %cst_13 {dimension_numbers = #tpu.dot_dimension_numbers<[1], [0], [0], [1], [0, 0, 1, 1], [], []>} : vector<8x128xbf16>, vector<128x512xbf16>, vector<8x512xf32> -> vector<8x512xf32>
    %40 = arith.addf %36, %39 : vector<8x512xf32>
    %41 = vector.extract_strided_slice %1 {offsets = [0, 0], sizes = [1, 512], strides = [1, 1]} : vector<8x512xf32> to vector<1x512xf32>
    %42 = vector.broadcast %41 : vector<1x512xf32> to vector<8x512xf32>
    %43 = arith.addf %40, %42 : vector<8x512xf32>
    %cst_14 = arith.constant 0.000000e+00 : f32
    %44 = vector.broadcast %cst_14 : f32 to vector<8x512xf32>
    %45 = arith.maximumf %43, %44 : vector<8x512xf32>
    %46 = vector.extract_strided_slice %1 {offsets = [3, 0], sizes = [1, 512], strides = [1, 1]} : vector<8x512xf32> to vector<1x512xf32>
    %47 = vector.broadcast %46 : vector<1x512xf32> to vector<8x512xf32>
    %48 = arith.subf %45, %47 : vector<8x512xf32>
    %49 = vector.extract_strided_slice %1 {offsets = [4, 0], sizes = [1, 512], strides = [1, 1]} : vector<8x512xf32> to vector<1x512xf32>
    %cst_15 = arith.constant 9.99999974E-6 : f32
    %50 = vector.broadcast %cst_15 : f32 to vector<1x512xf32>
    %51 = arith.addf %49, %50 : vector<1x512xf32>
    %52 = math.rsqrt %51 : vector<1x512xf32>
    %53 = vector.broadcast %52 : vector<1x512xf32> to vector<8x512xf32>
    %54 = arith.mulf %48, %53 : vector<8x512xf32>
    %55 = vector.extract_strided_slice %1 {offsets = [1, 0], sizes = [1, 512], strides = [1, 1]} : vector<8x512xf32> to vector<1x512xf32>
    %56 = vector.broadcast %55 : vector<1x512xf32> to vector<8x512xf32>
    %57 = arith.mulf %54, %56 : vector<8x512xf32>
    %58 = vector.extract_strided_slice %1 {offsets = [2, 0], sizes = [1, 512], strides = [1, 1]} : vector<8x512xf32> to vector<1x512xf32>
    %59 = vector.broadcast %58 : vector<1x512xf32> to vector<8x512xf32>
    %60 = arith.addf %57, %59 : vector<8x512xf32>
    %c0_16 = arith.constant 0 : index
    %c0_17 = arith.constant 0 : index
    %61 = vector.load %arg10[%c0_16, %c0_17] : memref<8x512xf32, #tpu.memory_space<vmem>>, vector<8x512xf32>
    tpu.vector_store %arg10[%c0_16, %c0_17], %60 {strides = array<i32>} : memref<8x512xf32, #tpu.memory_space<vmem>>, vector<8x512xf32>,
    %62 = arith.truncf %60 : vector<8x512xf32> to vector<8x512xbf16>
    %c0_18 = arith.constant 0 : index
    %c0_19 = arith.constant 0 : index
    %63 = vector.load %arg7[%c0_18, %c0_19] : memref<512x128xbf16, #tpu.memory_space<vmem>>, vector<512x128xbf16>
    %cst_20 = arith.constant dense<0.000000e+00> : vector<8x128xf32>
    %64 = tpu.matmul %62, %63, %cst_20 {dimension_numbers = #tpu.dot_dimension_numbers<[1], [0], [0], [1], [0, 0, 1, 1], [], []>} : vector<8x512xbf16>, vector<512x128xbf16>, vector<8x128xf32> -> vector<8x128xf32>
    %c0_21 = arith.constant 0 : index
    %c0_22 = arith.constant 0 : index
    %65 = vector.load %arg8[%c0_21, %c0_22] : memref<1x128xf32, #tpu.memory_space<vmem>>, vector<1x128xf32>
    %66 = vector.broadcast %65 : vector<1x128xf32> to vector<8x128xf32>
    %67 = arith.addf %64, %66 : vector<8x128xf32>
    %c0_23 = arith.constant 0 : index
    %c0_24 = arith.constant 0 : index
    %68 = vector.load %arg9[%c0_23, %c0_24] : memref<8x128xf32, #tpu.memory_space<vmem>>, vector<8x128xf32>
    tpu.vector_store %arg9[%c0_23, %c0_24], %67 {strides = array<i32>} : memref<8x128xf32, #tpu.memory_space<vmem>>, vector<8x128xf32>,
    return
  }
  func.func @transform_0(%arg0: i32) -> (i32, i32) {
    %c0_i32 = arith.constant 0 : i32
    %c0_i32_0 = arith.constant 0 : i32
    %c0_i32_1 = arith.constant 0 : i32
    return %c0_i32, %c0_i32_0 : i32, i32
  }
  func.func @transform_1(%arg0: i32) -> (i32, i32) {
    %c0_i32 = arith.constant 0 : i32
    %c0_i32_0 = arith.constant 0 : i32
    %c0_i32_1 = arith.constant 0 : i32
    return %c0_i32, %c0_i32_0 : i32, i32
  }
  func.func @transform_2(%arg0: i32) -> (i32, i32) {
    %c0_i32 = arith.constant 0 : i32
    %c0_i32_0 = arith.constant 0 : i32
    %c0_i32_1 = arith.constant 0 : i32
    return %c0_i32, %c0_i32_0 : i32, i32
  }
  func.func @transform_3(%arg0: i32) -> (i32, i32) {
    %c0_i32 = arith.constant 0 : i32
    %c0_i32_0 = arith.constant 0 : i32
    %c0_i32_1 = arith.constant 0 : i32
    return %c0_i32, %c0_i32_0 : i32, i32
  }
  func.func @transform_4(%arg0: i32) -> (i32, i32) {
    %c0_i32 = arith.constant 0 : i32
    %c0_i32_0 = arith.constant 0 : i32
    %c0_i32_1 = arith.constant 0 : i32
    return %c0_i32, %c0_i32_0 : i32, i32
  }
  func.func @transform_5(%arg0: i32) -> (i32, i32) {
    %c0_i32 = arith.constant 0 : i32
    %c0_i32_0 = arith.constant 0 : i32
    %c0_i32_1 = arith.constant 0 : i32
    return %c0_i32, %c0_i32_0 : i32, i32
  }
  func.func @transform_6(%arg0: i32) -> (i32, i32) {
    %c0_i32 = arith.constant 0 : i32
    %c0_i32_0 = arith.constant 0 : i32
    %c0_i32_1 = arith.constant 0 : i32
    return %c0_i32, %c0_i32_0 : i32, i32
  }
  func.func @transform_7(%arg0: i32) -> (i32, i32) {
    %c0_i32 = arith.constant 0 : i32
    %c0_i32_0 = arith.constant 0 : i32
    %c0_i32_1 = arith.constant 0 : i32
    return %c0_i32, %c0_i32_0 : i32, i32
  }
  func.func @transform_8(%arg0: i32) -> (i32, i32) {
    %c0_i32 = arith.constant 0 : i32
    %c0_i32_0 = arith.constant 0 : i32
    %c0_i32_1 = arith.constant 0 : i32
    return %c0_i32, %c0_i32_0 : i32, i32
  }
  func.func @transform_9(%arg0: i32) -> (i32, i32) {
    %c0_i32 = arith.constant 0 : i32
    %c0_i32_0 = arith.constant 0 : i32
    %c0_i32_1 = arith.constant 0 : i32
    return %c0_i32, %c0_i32_0 : i32, i32
  }
}

</mosaic_0001>

<bundles_post_ra>
// kernel: efficientnet_cls_forward.2
= control target key start
LH: loop header
LB: loop body
LE: loop exit
PB: predicated region body
PF: predicated region fallthrough
CT: control target
= control target key end

     0   :  { %s909_s15 = smov 0   ;;  %s911_s16 = smov 0   ;;  %s991_s0 = inlined_call_operand.vmem [shape: bf16[2,128,36], index: 0, kind: input, shape index: {}]   ;;  %s992_s1 = inlined_call_operand.vmem [shape: bf16[36,128], index: 1, kind: input, shape index: {}]   ;;  %s993_s2 = inlined_call_operand.vmem [shape: f32[2,16,128], index: 2, kind: output, shape index: {0}]   ;;  %s994_s3 = inlined_call_operand.vmem [shape: f32[2,1,128], index: 3, kind: output, shape index: {1}]   ;;  %s995_s4 = inlined_call_operand.vmem [shape: f32[2,1,128], index: 4, kind: output, shape index: {2}]  }
   0x1   :  { %s913_s17 = smov 0  }
   0x2 LB: > { %s27_s18 = sadd.s32 1, %s876_s16  ;;  %p752_p0 = scmp.ge.s32.totalorder %s880_s17, 1  ;;  %s880_s17 = sphi %s913_s17, %s15_s17   ;;  %s876_s16 = sphi %s911_s16, %s997_s16   ;;  %s872_s15 = sphi %s909_s15, %s996_s15  }
   0x3   : > { %p29_p1 = scmp.ge.s32.totalorder %s27_s18, 2  ;;  %p188_p2 = scmp.lt.s32.totalorder %s880_s17, 3 }
   0x5   : > { %s999_s18 = smov (%p29_p1, %s27_s18), 0  ;;  %p189_p3 = pnand %p752_p0, %p188_p2 }
   0x6   : > { %p228_p4 = scmp.lt.s32.totalorder (!%p189_p3), %s872_s15, 1 }
   0x7   : > { %192 = sbr.rel (%p189_p3) target bundleno = 350 (0x15e), region = 28 }
   0xc   : > { %v847_v0 = vld [vmem:[%s992_s1 + $0x10] ss:$0 sps:$4 sm:$0x33]   ;;  %vm353_vm0 = vcmask 1041408   ;;  %v848_v1 = vld [vmem:[%s992_s1 + $0x8] sm:$0xff]   ;;  %s1001_s15 = smov (!%p228_p4, %s872_s15), 1 }
   0xd   : > { %819 = vmatprep.subr.msk.bf16.mxu0 %vm353_vm0, %v847_v0  ;;  %v355_v2 = vsel %vm353_vm0, %v847_v0, 0  ;;  %820 = vmatprep.subr.msk.bf16.mxu1 %vm353_vm0, %v847_v0  ;;  %v849_v3 = vld [vmem:[%s992_s1] sm:$0xff]   ;;  %s778_s25 = sshll.u32 %s1001_s15, 6  ;;  %vm328_vm1 = vcmask 293888   ;;  %s954_s5 = scalar_lea.vmem %s995_s4, %s1001_s15  ;;  %v882_v12 = vmov -3.4028235e+38  }
   0xe   : > { %792 = vmatpush3.bf16.msra.mxu0 %v355_v2  ;;  %816 = vmatpush3.bf16.msra.mxu1 %v355_v2  ;;  %s235_s28 = scalar_lea.vmem %s991_s0, %s778_s25  ;;  %493 = vst [vmem:[%s954_s5] sm:$0x1] %v882_v12  ;;  %s961_s8 = scalar_lea.vmem %s994_s3, %s1001_s15  ;;  %v883_v13 = vmov 0.0  }
   0xf   : > { %793 = vmatprep.subr.bf16.mxu0 %v848_v1  ;;  %814 = vmatprep.subr.bf16.mxu1 %v848_v1  ;;  %v850_v4 = vld [vmem:[%s235_s28] sm:$0xff]   ;;  %v851_v5 = vld [vmem:[%s235_s28 + $0x8] sm:$0xff]   ;;  %v852_v6 = vld [vmem:[%s235_s28 + $0x10] sm:$0xff]   ;;  %492 = vst [vmem:[%s961_s8] sm:$0x1] %v883_v13  ;;  %s779_s9 = sshll.u32 %s1001_s15, 4 }
  0x10   : > { %797 = vmatprep.mubr.msk.bf16.mxu0 %vm328_vm1, %v850_v4  ;;  %v854_v7 = vld [vmem:[%s235_s28 + $0x20] sm:$0xff]   ;;  %v855_v8 = vld [vmem:[%s235_s28 + $0x28] sm:$0xff]   ;;  %v856_v9 = vld [vmem:[%s235_s28 + $0x30] sm:$0xff]   ;;  %s244_s12 = scalar_lea.vmem %s993_s2, %s779_s9 }
  0x11   : > { %805 = vmatprep.mubr.msk.bf16.mxu1 %vm328_vm1, %v854_v7  ;;  %v853_v10 = vld [vmem:[%s235_s28 + $0x18] sm:$0xff]  }
  0x12   : > { %794 = vmatpush3.bf16.msra.mxu0 %v848_v1  ;;  %817 = vmatpush3.bf16.msra.mxu1 %v848_v1  ;;  %v857_v11 = vld [vmem:[%s235_s28 + $0x38] sm:$0xff]  }
  0x13   : > { %795 = vmatprep.subr.bf16.mxu0 %v849_v3  ;;  %815 = vmatprep.subr.bf16.mxu1 %v849_v3 }
  0x15   : > { %v585_v0 = vld [vmem:[%s954_s5] sm:$0x1] }
  0x16   : > { %796 = vmatpush3.bf16.msra.mxu0 %v849_v3  ;;  %818 = vmatpush3.bf16.msra.mxu1 %v849_v3 }
  0x19   : > { %798 = vmatmul.mubr.msk.bf16.vlgmr.msra.gmra.mxu0 %vm328_vm1, %v851_v5  ;;  %806 = vmatmul.mubr.msk.bf16.vlgmr.msra.gmra.mxu1 %vm328_vm1, %v855_v8 }
  0x1a   : > { %801 = vmatprep.mubr.msk.bf16.mxu0 %vm328_vm1, %v852_v6  ;;  %809 = vmatprep.mubr.msk.bf16.mxu1 %vm328_vm1, %v856_v9  ;;  %v561_v9 = vld [vmem:[%s961_s8] sm:$0x1] }
  0x21   : > { %802 = vmatmul.mubr.msk.bf16.gmra.mxu0 %vm328_vm1, %v853_v10  ;;  %810 = vmatmul.mubr.msk.bf16.gmra.mxu1 %vm328_vm1, %v857_v11 }
  0xd9   : > { %v799_v14 = vpop.f32.mrf.mxu0  ;;  %v964_v15 = vpop.f32.mrf.mxu1 }
  0xdb   : > { %v391_v16 = vpop.f32.mrf.mxu0  ;;  %v423_v18 = vpop.f32.mrf.mxu1 }
  0xdc   : > { %454 = vxpose.xlu0.b32.start [1/16] (narrow) %v391_v16, 16 }
  0xdd   : > { %v800_v17 = vpop.f32.mrf.mxu0  ;;  %v966_v22 = vpop.f32.mrf.mxu1 }
  0xdf   : > { %v394_v19 = vpop.f32.mrf.mxu0  ;;  %v426_v29 = vpop.f32.mrf.mxu1 }
  0xe0   : > { %v562_v20 = vadd.f32 %v394_v19, %v391_v16  ;;  %455 = vxpose.xlu0.b32.cont [2/16] (narrow) %v394_v19, 16 }
  0xe1   : > { %v803_v21 = vpop.f32.mrf.mxu0  ;;  %v811_v38 = vpop.f32.mrf.mxu1 }
  0xe2   : > { %v563_v23 = vadd.f32 %v799_v14, %v562_v20  ;;  %v588_v24 = vmax.f32 %v799_v14, %v803_v21 }
  0xe3   : > { %v407_v25 = vpop.f32.mrf.mxu0  ;;  %v439_v46 = vpop.f32.mrf.mxu1 }
  0xe4   : > { %v564_v26 = vadd.f32 %v800_v17, %v563_v23  ;;  %v586_v27 = vmax.f32 %v391_v16, %v407_v25  ;;  %456 = vxpose.xlu0.b32.cont [3/16] (narrow) %v799_v14, 16  ;;  %v592_v32 = vmax.f32 %v588_v24, -3.4028235e+38 }
  0xe5   : > { %v804_v28 = vpop.f32.mrf.mxu0  ;;  %v812_v52 = vpop.f32.mrf.mxu1 }
  0xe6   : > { %v565_v30 = vadd.f32 %v564_v26, %v407_v25  ;;  %v589_v31 = vmax.f32 %v800_v17, %v804_v28  ;;  %v590_v34 = vmax.f32 %v586_v27, -3.4028235e+38  ;;  %v596_v42 = vmax.f32 %v592_v32, -3.4028235e+38 }
  0xe7   : > { %v410_v33 = vpop.f32.mrf.mxu0  ;;  %v442_v57 = vpop.f32.mrf.mxu1 }
  0xe8   : > { %v593_v35 = vmax.f32 %v589_v31, -3.4028235e+38  ;;  %v566_v36 = vadd.f32 %v565_v30, %v410_v33  ;;  %v587_v37 = vmax.f32 %v394_v19, %v410_v33  ;;  %457 = vxpose.xlu0.b32.cont [4/16] (narrow) %v800_v17, 16  ;;  %v594_v43 = vmax.f32 %v590_v34, -3.4028235e+38 }
  0xea   : > { %v597_v39 = vmax.f32 %v593_v35, -3.4028235e+38  ;;  %v567_v40 = vadd.f32 %v803_v21, %v566_v36  ;;  %v591_v41 = vmax.f32 %v587_v37, -3.4028235e+38 }
  0xec   : > { %v595_v44 = vmax.f32 %v591_v41, -3.4028235e+38  ;;  %v568_v45 = vadd.f32 %v804_v28, %v567_v40  ;;  %458 = vxpose.xlu0.b32.cont [5/16] (narrow) %v407_v25, 16  ;;  %v599_v47 = vmax.f32 %v596_v42, %v597_v39 }
  0xee   : > { %v598_v48 = vmax.f32 %v594_v43, %v595_v44  ;;  %v569_v49 = vadd.f32 %v568_v45, %v423_v18 }
  0xf0   : > { %v600_v50 = vmax.f32 %v598_v48, %v599_v47  ;;  %v570_v51 = vadd.f32 %v569_v49, %v426_v29  ;;  %459 = vxpose.xlu0.b32.cont [6/16] (narrow) %v410_v33, 16 }
  0xf2   : > { %v601_v53 = vrot.slane %v600_v50, 4  ;;  %v571_v54 = vadd.f32 %v964_v15, %v570_v51 }
  0xf4   : > { %v602_v55 = vmax.f32 %v600_v50, %v601_v53  ;;  %v572_v56 = vadd.f32 %v966_v22, %v571_v54  ;;  %460 = vxpose.xlu0.b32.cont [7/16] (narrow) %v803_v21, 16 }
  0xf6   : > { %v603_v58 = vrot.slane %v602_v55, 2  ;;  %v573_v59 = vadd.f32 %v572_v56, %v439_v46 }
  0xf8   : > { %v604_v60 = vmax.f32 %v602_v55, %v603_v58  ;;  %v574_v61 = vadd.f32 %v573_v59, %v442_v57  ;;  %461 = vxpose.xlu0.b32.cont [8/16] (narrow) %v804_v28, 16 }
  0xfa   : > { %v605_v62 = vrot.slane %v604_v60, 1  ;;  %v575_v63 = vadd.f32 %v811_v38, %v574_v61 }
  0xfc   : > { %v606_v1 = vmax.f32 %v604_v60, %v605_v62  ;;  %v576_v2 = vadd.f32 %v812_v52, %v575_v63  ;;  %462 = vxpose.xlu0.b32.cont [9/16] (narrow) %v423_v18, 16 }
  0xfe   : > { %v607_v3 = vmax.f32 %v585_v0, %v606_v1  ;;  %v577_v4 = vrot.slane %v576_v2, 4 }
 0x100   : > { %608 = vst [vmem:[%s954_s5] sm:$0x1] %v607_v3  ;;  %v578_v5 = vadd.f32 %v577_v4, %v576_v2  ;;  %463 = vxpose.xlu0.b32.cont [10/16] (narrow) %v426_v29, 16 }
 0x102   : > { %v579_v6 = vrot.slane %v578_v5, 2 }
 0x104   : > { %v580_v7 = vadd.f32 %v579_v6, %v578_v5  ;;  %464 = vxpose.xlu0.b32.cont [11/16] (narrow) %v964_v15, 16 }
 0x106   : > { %v581_v8 = vrot.slane %v580_v7, 1 }
 0x108   : > { %v582_v10 = vadd.f32 %v581_v8, %v580_v7  ;;  %465 = vxpose.xlu0.b32.cont [12/16] (narrow) %v966_v22, 16 }
 0x10a   : > { %v583_v11 = vadd.f32 %v582_v10, %v561_v9 }
 0x10c   : > { %584 = vst [vmem:[%s961_s8] sm:$0x1] %v583_v11  ;;  %466 = vxpose.xlu0.b32.cont [13/16] (narrow) %v439_v46, 16 }
 0x110   : > { %467 = vxpose.xlu0.b32.cont [14/16] (narrow) %v442_v57, 16 }
 0x113   : > { %v612_v12 = vld [vmem:[%s961_s8] sm:$0x1] }
 0x114   : > { %v613_v13 = vmul.f32 0.015625, %v612_v12  ;;  %468 = vxpose.xlu0.b32.cont [15/16] (narrow) %v811_v38, 16 }
 0x116   : > { %614 = vst [vmem:[%s961_s8] sm:$0x1] %v613_v13 }
 0x118   : > { %469 = vxpose.xlu0.b32.end [16/16] (narrow) %v812_v52, 16 }
 0x158   : > { %v470_v14 = vpop.trf.xlu0 }
 0x159   : > { %486 = vst [vmem:[%s244_s12] sm:$0xff] %v470_v14 }
 0x15c   : > { %v471_v15 = vpop.trf.xlu0 }
 0x15d   : > { %487 = vst [vmem:[%s244_s12 + $0x8] sm:$0xff] %v471_v15 }
 0x15e PF: > { %s15_s17 = sadd.s32 1, %s880_s17   ;;  %s996_s15 = smov %s876_s16 }
 0x15f   : > { %p12_p5 = scmp.ge.s32.totalorder %s15_s17, 4   ;;  %s997_s16 = smov %s999_s18 }
 0x161   :  { %14 = sbr.rel (!%p12_p5) target bundleno = 2 (0x2), region = 90 }

// kernel: efficientnet_cls_forward.3
= control target key start
LH: loop header
LB: loop body
LE: loop exit
PB: predicated region body
PF: predicated region fallthrough
CT: control target
= control target key end

     0   :  { %v1383_v1 = vmov 0   ;;  %v38_v25 = vlaneseq  ;;  %s1847_s4 = inlined_call_operand.vmem [shape: bf16[128,512], index: 4, kind: input, shape index: {}]   ;;  %s1848_s2 = inlined_call_operand.vmem [shape: f32[8,128], index: 2, kind: input, shape index: {}]   ;;  %s1849_s3 = inlined_call_operand.vmem [shape: bf16[128,512], index: 3, kind: input, shape index: {}]   ;;  %s1850_s1 = inlined_call_operand.vmem [shape: f32[8,128], index: 1, kind: input, shape index: {}]   ;;  %s1851_s0 = inlined_call_operand.vmem [shape: f32[8,128], index: 0, kind: input, shape index: {}]   ;;  %s1852_s6 = inlined_call_operand.vmem [shape: bf16[512,128], index: 6, kind: input, shape index: {}]   ;;  %s1853_s5 = inlined_call_operand.vmem [shape: f32[8,512], index: 5, kind: input, shape index: {}]   ;;  %s1854_s9 = inlined_call_operand.vmem [shape: f32[8,512], index: 9, kind: output, shape index: {1}]   ;;  %s1855_s7 = inlined_call_operand.vmem [shape: f32[1,128], index: 7, kind: input, shape index: {}]   ;;  %s1856_s8 = inlined_call_operand.vmem [shape: f32[8,128], index: 8, kind: output, shape index: {0}]  }
   0x1   :  { %v1245_v0 = vld [vmem:[%s1847_s4 + $0xe4] ss:$16 sps:$4 sm:$0xff]   ;;  %339 = vmatprep.mubr.bf16.mxu0 %v1383_v1  ;;  %380 = vmatprep.mubr.bf16.mxu1 %v1383_v1  ;;  %v1247_v2 = vld [vmem:[%s1847_s4 + $0xec] ss:$16 sps:$4 sm:$0xff]   ;;  %v1249_v3 = vld [vmem:[%s1847_s4 + $0xe0] ss:$16 sps:$4 sm:$0xff]  }
   0x2   :  { %307 = vmatprep.subr.bf16.mxu0 %v1245_v0  ;;  %v1250_v4 = vld [vmem:[%s1847_s4 + $0xe8] ss:$16 sps:$4 sm:$0xff]   ;;  %348 = vmatprep.subr.bf16.mxu1 %v1247_v2  ;;  %v1251_v5 = vld [vmem:[%s1847_s4 + $0xc4] ss:$16 sps:$4 sm:$0xff]   ;;  %v1253_v6 = vld [vmem:[%s1847_s4 + $0xcc] ss:$16 sps:$4 sm:$0xff]  }
   0x3   :  { %308 = vmatpush1.bf16.msra.mxu0 %v1249_v3  ;;  %349 = vmatpush1.bf16.msra.mxu1 %v1250_v4  ;;  %v1255_v7 = vld [vmem:[%s1847_s4 + $0xc0] ss:$16 sps:$4 sm:$0xff]   ;;  %v1256_v8 = vld [vmem:[%s1847_s4 + $0xc8] ss:$16 sps:$4 sm:$0xff]   ;;  %v1257_v9 = vld [vmem:[%s1847_s4 + $0xa4] ss:$16 sps:$4 sm:$0xff]  }
   0x4   :  { %309 = vmatprep.subr.bf16.mxu0 %v1251_v5  ;;  %350 = vmatprep.subr.bf16.mxu1 %v1253_v6  ;;  %v1259_v10 = vld [vmem:[%s1847_s4 + $0xac] ss:$16 sps:$4 sm:$0xff]   ;;  %v1261_v11 = vld [vmem:[%s1847_s4 + $0xa0] ss:$16 sps:$4 sm:$0xff]   ;;  %v1262_v12 = vld [vmem:[%s1847_s4 + $0xa8] ss:$16 sps:$4 sm:$0xff]  }
   0x5   :  { %v1263_v13 = vld [vmem:[%s1847_s4 + $0x84] ss:$16 sps:$4 sm:$0xff]   ;;  %v1265_v14 = vld [vmem:[%s1847_s4 + $0x8c] ss:$16 sps:$4 sm:$0xff]   ;;  %v1267_v15 = vld [vmem:[%s1847_s4 + $0x80] ss:$16 sps:$4 sm:$0xff]  }
   0x6   :  { %v1268_v16 = vld [vmem:[%s1847_s4 + $0x88] ss:$16 sps:$4 sm:$0xff]   ;;  %v1269_v17 = vld [vmem:[%s1847_s4 + $0x64] ss:$16 sps:$4 sm:$0xff]   ;;  %v1271_v18 = vld [vmem:[%s1847_s4 + $0x6c] ss:$16 sps:$4 sm:$0xff]  }
   0x7   :  { %310 = vmatpush1.bf16.msra.mxu0 %v1255_v7  ;;  %351 = vmatpush1.bf16.msra.mxu1 %v1256_v8  ;;  %v1273_v19 = vld [vmem:[%s1847_s4 + $0x60] ss:$16 sps:$4 sm:$0xff]   ;;  %v1274_v20 = vld [vmem:[%s1847_s4 + $0x68] ss:$16 sps:$4 sm:$0xff]   ;;  %v1275_v21 = vld [vmem:[%s1847_s4 + $0x44] ss:$16 sps:$4 sm:$0xff]  }
   0x8   :  { %311 = vmatprep.subr.bf16.mxu0 %v1257_v9  ;;  %352 = vmatprep.subr.bf16.mxu1 %v1259_v10  ;;  %v1277_v22 = vld [vmem:[%s1847_s4 + $0x4c] ss:$16 sps:$4 sm:$0xff]   ;;  %v1279_v23 = vld [vmem:[%s1847_s4 + $0x40] ss:$16 sps:$4 sm:$0xff]   ;;  %v1280_v24 = vld [vmem:[%s1847_s4 + $0x48] ss:$16 sps:$4 sm:$0xff]  }
   0x9   :  { %v1281_v26 = vld [vmem:[%s1847_s4 + $0x24] ss:$16 sps:$4 sm:$0xff]   ;;  %v1283_v27 = vld [vmem:[%s1847_s4 + $0x2c] ss:$16 sps:$4 sm:$0xff]   ;;  %v1285_v30 = vld [vmem:[%s1847_s4 + $0x20] ss:$16 sps:$4 sm:$0xff]  }
   0xa   :  { %v1517_v28 = vld [vmem:[%s1848_s2] sm:$0xff]  ;;  %v1286_v31 = vld [vmem:[%s1847_s4 + $0x28] ss:$16 sps:$4 sm:$0xff]   ;;  %v1526_v32 = vshrl.u32 %v38_v25, 7  ;;  %v1289_v34 = vld [vmem:[%s1847_s4 + $0xc] ss:$16 sps:$4 sm:$0xff]  }
   0xb   :  { %312 = vmatpush1.bf16.msra.mxu0 %v1261_v11  ;;  %353 = vmatpush1.bf16.msra.mxu1 %v1262_v12  ;;  %v43_v29 = vadd.f32 1e-05, %v1517_v28  ;;  %v1287_v33 = vld [vmem:[%s1847_s4 + $0x4] ss:$16 sps:$4 sm:$0xff]   ;;  %v1291_v35 = vld [vmem:[%s1847_s4] ss:$16 sps:$4 sm:$0xff]  }
   0xc   :  { %313 = vmatprep.subr.bf16.mxu0 %v1263_v13  ;;  %354 = vmatprep.subr.bf16.mxu1 %v1265_v14  ;;  %v1292_v36 = vld [vmem:[%s1847_s4 + $0x8] ss:$16 sps:$4 sm:$0xff]   ;;  %v63_v37 = vsub.s32 6, %v1526_v32  ;;  %v1295_v38 = vld [vmem:[%s1849_s3 + $0xe4] ss:$16 sps:$4 sm:$0xff]   ;;  %v68_v42 = vsub.s32 7, %v1526_v32 }
   0xd   :  { %1373 = vrsqrt.f32 %v43_v29  ;;  %v1298_v39 = vld [vmem:[%s1849_s3 + $0xec] ss:$16 sps:$4 sm:$0xff]   ;;  %v60_v41 = vld [vmem:[%s1850_s1] sm:$0xff]  ;;  %v1553_v43 = vsub.s32 4, %v1526_v32  ;;  %v78_v45 = vsub.s32 5, %v1526_v32  ;;  %v1586_v62 = vsub.s32 2, %v1526_v32 }
   0xe   :  { %v64_v40 = vrot.slane %v1517_v28, %v63_v37  ;;  %v1293_v53 = vld [vmem:[%s1849_s3 + $0xe0] ss:$16 sps:$4 sm:$0xff]   ;;  %v1296_v54 = vld [vmem:[%s1849_s3 + $0xe8] ss:$16 sps:$4 sm:$0xff]   ;;  %v1301_v56 = vld [vmem:[%s1849_s3 + $0xc4] ss:$16 sps:$4 sm:$0xff]  }
   0xf   :  { %314 = vmatpush1.bf16.msra.mxu0 %v1267_v15  ;;  %355 = vmatpush1.bf16.msra.mxu1 %v1268_v16  ;;  %v74_v48 = vrot.slane %v1517_v28, %v1553_v43  ;;  %v79_v50 = vrot.slane %v1517_v28, %v78_v45  ;;  %v1304_v57 = vld [vmem:[%s1849_s3 + $0xcc] ss:$16 sps:$4 sm:$0xff]   ;;  %v1299_v58 = vld [vmem:[%s1849_s3 + $0xc0] ss:$16 sps:$4 sm:$0xff]   ;;  %v1302_v59 = vld [vmem:[%s1849_s3 + $0xc8] ss:$16 sps:$4 sm:$0xff]   ;;  %v41_v3 = vrot.slane %v1517_v28, %v1586_v62 }
  0x10   :  { %315 = vmatprep.subr.bf16.mxu0 %v1269_v17  ;;  %356 = vmatprep.subr.bf16.mxu1 %v1271_v18  ;;  %v65_v44 = vsub.f32 %v60_v41, %v64_v40  ;;  %v1307_v60 = vld [vmem:[%s1849_s3 + $0xa4] ss:$16 sps:$4 sm:$0xff]   ;;  %v1310_v61 = vld [vmem:[%s1849_s3 + $0xac] ss:$16 sps:$4 sm:$0xff]   ;;  %v1305_v63 = vld [vmem:[%s1849_s3 + $0xa0] ss:$16 sps:$4 sm:$0xff]  }
  0x11   :  { %v1308_v0 = vld [vmem:[%s1849_s3 + $0xa8] ss:$16 sps:$4 sm:$0xff]   ;;  %v1313_v2 = vld [vmem:[%s1849_s3 + $0x84] ss:$16 sps:$4 sm:$0xff]   ;;  %v1603_v4 = vsub.s32 3, %v1526_v32  ;;  %v1622_v12 = vsub.s32 0, %v1526_v32 }
  0x12   :  { %v1311_v5 = vld [vmem:[%s1849_s3 + $0x80] ss:$16 sps:$4 sm:$0xff]   ;;  %v1314_v6 = vld [vmem:[%s1849_s3 + $0x88] ss:$16 sps:$4 sm:$0xff]   ;;  %v1319_v8 = vld [vmem:[%s1849_s3 + $0x64] ss:$16 sps:$4 sm:$0xff]  }
  0x13   :  { %316 = vmatpush1.bf16.msra.mxu0 %v1273_v19  ;;  %357 = vmatpush1.bf16.msra.mxu1 %v1274_v20  ;;  %v37_v7 = vld [vmem:[%s1851_s0] sm:$0xff]  ;;  %v1322_v9 = vld [vmem:[%s1849_s3 + $0x6c] ss:$16 sps:$4 sm:$0xff]   ;;  %v1320_v14 = vld [vmem:[%s1849_s3 + $0x68] ss:$16 sps:$4 sm:$0xff]   ;;  %v53_v18 = vrot.slane %v1517_v28, %v1622_v12  ;;  %v1639_v19 = vsub.s32 1, %v1526_v32 }
  0x14   :  { %317 = vmatprep.subr.bf16.mxu0 %v1275_v21  ;;  %358 = vmatprep.subr.bf16.mxu1 %v1277_v22  ;;  %v42_v10 = vsub.f32 %v37_v7, %v41_v3  ;;  %v1317_v13 = vld [vmem:[%s1849_s3 + $0x60] ss:$16 sps:$4 sm:$0xff]   ;;  %v1325_v15 = vld [vmem:[%s1849_s3 + $0x44] ss:$16 sps:$4 sm:$0xff]   ;;  %v1328_v16 = vld [vmem:[%s1849_s3 + $0x4c] ss:$16 sps:$4 sm:$0xff]  }
  0x15   :  { %v1323_v20 = vld [vmem:[%s1849_s3 + $0x40] ss:$16 sps:$4 sm:$0xff]   ;;  %v1326_v21 = vld [vmem:[%s1849_s3 + $0x48] ss:$16 sps:$4 sm:$0xff]   ;;  %v1331_v22 = vld [vmem:[%s1849_s3 + $0x24] ss:$16 sps:$4 sm:$0xff]   ;;  %v58_v25 = vrot.slane %v1517_v28, %v1639_v19 }
  0x16   :  { %v1337_v29 = vld [vmem:[%s1849_s3 + $0x4] ss:$16 sps:$4 sm:$0xff]   ;;  %v1340_v28 = vld [vmem:[%s1849_s3 + $0xc] ss:$16 sps:$4 sm:$0xff]   ;;  %v1338_v32 = vld [vmem:[%s1849_s3 + $0x8] ss:$16 sps:$4 sm:$0xff]  }
  0x17   :  { %318 = vmatpush1.bf16.msra.mxu0 %v1279_v23  ;;  %359 = vmatpush1.bf16.msra.mxu1 %v1280_v24  ;;  %v1334_v23 = vld [vmem:[%s1849_s3 + $0x2c] ss:$16 sps:$4 sm:$0xff]   ;;  %v1347_v40 = vld [vmem:[%s1852_s6 + $0x30] sm:$0xff]   ;;  %v1372_v3 = vld [vmem:[%s1852_s6 + $0x80] sm:$0xff]  }
  0x18   :  { %319 = vmatprep.subr.bf16.mxu0 %v1281_v26  ;;  %360 = vmatprep.subr.bf16.mxu1 %v1283_v27  ;;  %v1329_v26 = vld [vmem:[%s1849_s3 + $0x20] ss:$16 sps:$4 sm:$0xff]   ;;  %v1332_v27 = vld [vmem:[%s1849_s3 + $0x28] ss:$16 sps:$4 sm:$0xff]  }
  0x19   :  { %v1344_v37 = vld [vmem:[%s1852_s6 + $0xb8] sm:$0xff]   ;;  %v1348_v41 = vld [vmem:[%s1852_s6 + $0xb0] sm:$0xff]   ;;  %v1351_v45 = vld [vmem:[%s1852_s6 + $0x28] sm:$0xff]  }
  0x1a   :  { %v1374_v46 = vpop.eup %1373 }
  0x1b   :  { %320 = vmatpush1.bf16.msra.mxu0 %v1285_v30  ;;  %361 = vmatpush1.bf16.msra.mxu1 %v1286_v31  ;;  %v69_v47 = vrot.slane %v1374_v46, %v68_v42  ;;  %v48_v11 = vrot.slane %v1374_v46, %v1603_v4  ;;  %v1335_v31 = vld [vmem:[%s1849_s3] ss:$16 sps:$4 sm:$0xff]   ;;  %v1349_v42 = vld [vmem:[%s1852_s6 + $0x68] sm:$0xff]  }
  0x1c   :  { %321 = vmatprep.subr.bf16.mxu0 %v1287_v33  ;;  %362 = vmatprep.subr.bf16.mxu1 %v1289_v34  ;;  %v1341_v34 = vld [vmem:[%s1852_s6 + $0x78] sm:$0xff]   ;;  %v1352_v46 = vld [vmem:[%s1852_s6 + $0xa8] sm:$0xff]  }
  0x1d   :  { %v70_v49 = vmul.f32 %v69_v47, %v65_v44  ;;  %v49_v17 = vmul.f32 %v48_v11, %v42_v10  ;;  %v1350_v44 = vld [vmem:[%s1852_s6 + $0xe8] sm:$0xff]   ;;  %v1353_v47 = vld [vmem:[%s1852_s6 + $0x60] sm:$0xff]  }
  0x1f   :  { %322 = vmatpush1.bf16.msra.mxu0 %v1291_v35  ;;  %363 = vmatpush1.bf16.msra.mxu1 %v1292_v36  ;;  %v75_v51 = vmul.f32 %v74_v48, %v70_v49  ;;  %v54_v24 = vmul.f32 %v53_v18, %v49_v17  ;;  %v1342_v35 = vld [vmem:[%s1852_s6 + $0xf8] sm:$0xff]   ;;  %v1354_v48 = vld [vmem:[%s1852_s6 + $0xe0] sm:$0xff]  }
  0x20   :  { %549 = vmatprep.subr.bf16.mxu0 %v1295_v38  ;;  %590 = vmatprep.subr.bf16.mxu1 %v1298_v39  ;;  %v1343_v36 = vld [vmem:[%s1852_s6 + $0x38] sm:$0xff]   ;;  %v1345_v38 = vld [vmem:[%s1852_s6 + $0x70] sm:$0xff]   ;;  %v1355_v49 = vld [vmem:[%s1852_s6 + $0x20] sm:$0xff]  }
  0x21   :  { %v80_v52 = vadd.f32 %v79_v50, %v75_v51  ;;  %v59_v30 = vadd.f32 %v58_v25, %v54_v24  ;;  %v1346_v39 = vld [vmem:[%s1852_s6 + $0xf0] sm:$0xff]   ;;  %v1356_v50 = vld [vmem:[%s1852_s6 + $0xa0] sm:$0xff]   ;;  %v1357_v51 = vld [vmem:[%s1852_s6 + $0x58] sm:$0xff]  }
  0x22   :  { %v1788_v18 = vld [vmem:[%s1853_s5 + $0x18] sm:$0xff] }
  0x23   :  { %v114_v55 = vpack.c.bf16 %v80_v52, %v80_v52  ;;  %v81_v33 = vpack.c.bf16 %v59_v30, %v59_v30  ;;  %v1358_v52 = vld [vmem:[%s1852_s6 + $0xd8] sm:$0xff]  }
  0x25   :  { %340 = vmatmul.mubr.bf16.vlgmr.msra.gmra.mxu0 %v114_v55  ;;  %381 = vmatmul.mubr.bf16.vlgmr.msra.gmra.mxu1 %v114_v55  ;;  %v1361_v55 = vld [vmem:[%s1852_s6 + $0x50] sm:$0xff]  }
  0x26   :  { %550 = vmatpush1.bf16.msra.mxu0 %v1293_v53  ;;  %591 = vmatpush1.bf16.msra.mxu1 %v1296_v54  ;;  %v1359_v53 = vld [vmem:[%s1852_s6 + $0x18] sm:$0xff]  }
  0x27   :  { %551 = vmatprep.subr.bf16.mxu0 %v1301_v56  ;;  %592 = vmatprep.subr.bf16.mxu1 %v1304_v57  ;;  %v1360_v54 = vld [vmem:[%s1852_s6 + $0x98] sm:$0xff]   ;;  %v1362_v56 = vld [vmem:[%s1852_s6 + $0xd0] sm:$0xff]  }
  0x28   :  { %581 = vmatprep.mubr.bf16.mxu0 %v1383_v1  ;;  %622 = vmatprep.mubr.bf16.mxu1 %v1383_v1  ;;  %v1316_v1 = vld [vmem:[%s1849_s3 + $0x8c] ss:$16 sps:$4 sm:$0xff]   ;;  %v1363_v57 = vld [vmem:[%s1852_s6 + $0x10] sm:$0xff]  }
  0x2a   :  { %552 = vmatpush1.bf16.msra.mxu0 %v1299_v58  ;;  %593 = vmatpush1.bf16.msra.mxu1 %v1302_v59  ;;  %v1364_v58 = vld [vmem:[%s1852_s6 + $0x90] sm:$0xff]   ;;  %v1365_v59 = vld [vmem:[%s1852_s6 + $0x48] sm:$0xff]  }
  0x2b   :  { %553 = vmatprep.subr.bf16.mxu0 %v1307_v60  ;;  %594 = vmatprep.subr.bf16.mxu1 %v1310_v61  ;;  %v1366_v60 = vld [vmem:[%s1852_s6 + $0xc8] sm:$0xff]  }
  0x2c   :  { %v1367_v61 = vld [vmem:[%s1852_s6 + $0x8] sm:$0xff]  }
  0x2e   :  { %554 = vmatpush1.bf16.msra.mxu0 %v1305_v63  ;;  %595 = vmatpush1.bf16.msra.mxu1 %v1308_v0  ;;  %v1368_v63 = vld [vmem:[%s1852_s6 + $0x88] sm:$0xff]   ;;  %v1369_v0 = vld [vmem:[%s1852_s6 + $0x40] sm:$0xff]  }
  0x2f   :  { %555 = vmatprep.subr.bf16.mxu0 %v1313_v2  ;;  %596 = vmatprep.subr.bf16.mxu1 %v1316_v1  ;;  %v1370_v2 = vld [vmem:[%s1852_s6 + $0xc0] sm:$0xff]  }
  0x30   :  { %v1371_v1 = vld [vmem:[%s1852_s6] sm:$0xff]  }
  0x32   :  { %556 = vmatpush1.bf16.msra.mxu0 %v1311_v5  ;;  %597 = vmatpush1.bf16.msra.mxu1 %v1314_v6 }
  0x33   :  { %557 = vmatprep.subr.bf16.mxu0 %v1319_v8  ;;  %598 = vmatprep.subr.bf16.mxu1 %v1322_v9 }
  0x36   :  { %558 = vmatpush1.bf16.msra.mxu0 %v1317_v13  ;;  %599 = vmatpush1.bf16.msra.mxu1 %v1320_v14  ;;  %v1772_v14 = vld [vmem:[%s1853_s5] sm:$0xff] }
  0x37   :  { %559 = vmatprep.subr.bf16.mxu0 %v1325_v15  ;;  %600 = vmatprep.subr.bf16.mxu1 %v1328_v16  ;;  %v1777_v15 = vld [vmem:[%s1853_s5 + $0x10] sm:$0xff]  ;;  %v1782_v16 = vld [vmem:[%s1853_s5 + $0x8] sm:$0xff]  ;;  %v675_v17 = vadd.f32 1e-05, %v1772_v14 }
  0x38   :  { %v642_v24 = vrot.slane %v1777_v15, %v1622_v12 }
  0x39   :  { %1375 = vrsqrt.f32 %v675_v17 }
  0x3a   :  { %560 = vmatpush1.bf16.msra.mxu0 %v1323_v20  ;;  %601 = vmatpush1.bf16.msra.mxu1 %v1326_v21  ;;  %v677_v20 = vadd.f32 1e-05, %v1777_v15  ;;  %v676_v21 = vadd.f32 1e-05, %v1782_v16 }
  0x3b   :  { %561 = vmatprep.subr.bf16.mxu0 %v1331_v22  ;;  %602 = vmatprep.subr.bf16.mxu1 %v1334_v23  ;;  %v678_v22 = vadd.f32 1e-05, %v1788_v18  ;;  %v634_v23 = vrot.slane %v1772_v14, %v1622_v12 }
  0x3c   :  { %1377 = vrsqrt.f32 %v677_v20 }
  0x3d   :  { %1379 = vrsqrt.f32 %v676_v21 }
  0x3e   :  { %562 = vmatpush1.bf16.msra.mxu0 %v1329_v26  ;;  %603 = vmatpush1.bf16.msra.mxu1 %v1332_v27  ;;  %1381 = vrsqrt.f32 %v678_v22 }
  0x3f   :  { %563 = vmatprep.subr.bf16.mxu0 %v1337_v29  ;;  %604 = vmatprep.subr.bf16.mxu1 %v1340_v28 }
  0x42   :  { %564 = vmatpush1.bf16.msra.mxu0 %v1335_v31  ;;  %605 = vmatpush1.bf16.msra.mxu1 %v1338_v32  ;;  %v638_v31 = vrot.slane %v1782_v16, %v1622_v12  ;;  %v646_v32 = vrot.slane %v1788_v18, %v1622_v12  ;;  %v662_v12 = vrot.slane %v1782_v16, %v1603_v4 }
  0x43   :  { %1200 = vmatprep.subr.bf16.mxu0 %v1341_v34  ;;  %1222 = vmatprep.subr.bf16.mxu1 %v1342_v35  ;;  %v658_v34 = vrot.slane %v1772_v14, %v1603_v4  ;;  %v666_v35 = vrot.slane %v1777_v15, %v1603_v4 }
  0x45   :  { %582 = vmatmul.mubr.bf16.vlgmr.msra.gmra.mxu0 %v81_v33  ;;  %623 = vmatmul.mubr.bf16.vlgmr.msra.gmra.mxu1 %v81_v33 }
  0x46   :  { %1201 = vmatpush3.bf16.msra.mxu0 %v1343_v36  ;;  %1223 = vmatpush3.bf16.msra.mxu1 %v1344_v37  ;;  %v1376_v25 = vpop.eup %1375 }
  0x47   :  { %1202 = vmatprep.subr.bf16.mxu0 %v1345_v38  ;;  %1224 = vmatprep.subr.bf16.mxu1 %v1346_v39 }
  0x49   :  { %v1378_v29 = vpop.eup %1377 }
  0x4a   :  { %1203 = vmatpush3.bf16.msra.mxu0 %v1347_v40  ;;  %1225 = vmatpush3.bf16.msra.mxu1 %v1348_v41  ;;  %v1380_v33 = vpop.eup %1379 }
  0x4b   :  { %1204 = vmatprep.subr.bf16.mxu0 %v1349_v42  ;;  %1226 = vmatprep.subr.bf16.mxu1 %v1350_v44  ;;  %v1382_v38 = vpop.eup %1381  ;;  %v686_v44 = vrot.slane %v1376_v25, %v1553_v43  ;;  %v1167_v25 = vld [vmem:[%s1855_s7] ss:$0 sm:$0xff] }
  0x4e   :  { %1205 = vmatpush3.bf16.msra.mxu0 %v1351_v45  ;;  %1227 = vmatpush3.bf16.msra.mxu1 %v1352_v46  ;;  %v694_v45 = vrot.slane %v1378_v29, %v1553_v43  ;;  %v670_v46 = vrot.slane %v1788_v18, %v1603_v4 }
  0x4f   :  { %1206 = vmatprep.subr.bf16.mxu0 %v1353_v47  ;;  %1228 = vmatprep.subr.bf16.mxu1 %v1354_v48 }
  0x52   :  { %1207 = vmatpush3.bf16.msra.mxu0 %v1355_v49  ;;  %1229 = vmatpush3.bf16.msra.mxu1 %v1356_v50 }
  0x53   :  { %1208 = vmatprep.subr.bf16.mxu0 %v1357_v51  ;;  %1230 = vmatprep.subr.bf16.mxu1 %v1358_v52 }
  0x56   :  { %1209 = vmatpush3.bf16.msra.mxu0 %v1359_v53  ;;  %1231 = vmatpush3.bf16.msra.mxu1 %v1360_v54  ;;  %v706_v53 = vrot.slane %v1772_v14, %v1639_v19  ;;  %v714_v54 = vrot.slane %v1777_v15, %v1639_v19 }
  0x57   :  { %1210 = vmatprep.subr.bf16.mxu0 %v1361_v55  ;;  %1232 = vmatprep.subr.bf16.mxu1 %v1362_v56  ;;  %v690_v55 = vrot.slane %v1380_v33, %v1553_v43  ;;  %v698_v56 = vrot.slane %v1382_v38, %v1553_v43 }
  0x5a   :  { %1211 = vmatpush3.bf16.msra.mxu0 %v1363_v57  ;;  %1233 = vmatpush3.bf16.msra.mxu1 %v1364_v58 }
  0x5b   :  { %1212 = vmatprep.subr.bf16.mxu0 %v1365_v59  ;;  %1234 = vmatprep.subr.bf16.mxu1 %v1366_v60 }
  0x5e   :  { %1213 = vmatpush3.bf16.msra.mxu0 %v1367_v61  ;;  %1235 = vmatpush3.bf16.msra.mxu1 %v1368_v63  ;;  %v710_v63 = vrot.slane %v1782_v16, %v1639_v19 }
  0x5f   :  { %1214 = vmatprep.subr.bf16.mxu0 %v1369_v0  ;;  %1236 = vmatprep.subr.bf16.mxu1 %v1370_v2  ;;  %v718_v0 = vrot.slane %v1788_v18, %v1639_v19  ;;  %v726_v2 = vrot.slane %v1772_v14, %v1586_v62 }
  0x62   :  { %1215 = vmatpush3.bf16.msra.mxu0 %v1371_v1  ;;  %1237 = vmatpush3.bf16.msra.mxu1 %v1372_v3  ;;  %v734_v1 = vrot.slane %v1777_v15, %v1586_v62 }
  0xe5   :  { %v341_v5 = vpop.f32.mrf.mxu0  ;;  %v382_v6 = vpop.f32.mrf.mxu1 }
  0xe7   :  { %v343_v7 = vpop.f32.mrf.mxu0  ;;  %v384_v8 = vpop.f32.mrf.mxu1 }
  0xe9   :  { %v345_v9 = vpop.f32.mrf.mxu0  ;;  %v386_v10 = vpop.f32.mrf.mxu1 }
  0xeb   :  { %v346_v11 = vpop.f32.mrf.mxu0  ;;  %v387_v13 = vpop.f32.mrf.mxu1 }
 0x105   :  { %v583_v26 = vpop.f32.mrf.mxu0  ;;  %v624_v27 = vpop.f32.mrf.mxu1 }
 0x106   :  { %v584_v28 = vadd.f32 %v583_v26, %v341_v5  ;;  %v625_v30 = vadd.f32 %v624_v27, %v382_v6 }
 0x107   :  { %v585_v36 = vpop.f32.mrf.mxu0  ;;  %v626_v37 = vpop.f32.mrf.mxu1 }
 0x108   :  { %v647_v39 = vadd.f32 %v634_v23, %v584_v28  ;;  %v649_v40 = vadd.f32 %v642_v24, %v625_v30  ;;  %v586_v41 = vadd.f32 %v585_v36, %v343_v7  ;;  %v627_v42 = vadd.f32 %v626_v37, %v384_v8 }
 0x109   :  { %v587_v47 = vpop.f32.mrf.mxu0  ;;  %v628_v48 = vpop.f32.mrf.mxu1  ;;  %v730_v7 = vrot.slane %v1782_v16, %v1586_v62  ;;  %v738_v8 = vrot.slane %v1788_v18, %v1586_v62 }
 0x10a   :  { %v651_v49 = vmax.f32 %v647_v39, 0.0  ;;  %v653_v50 = vmax.f32 %v649_v40, 0.0  ;;  %v648_v51 = vadd.f32 %v638_v31, %v586_v41  ;;  %v650_v52 = vadd.f32 %v646_v32, %v627_v42 }
 0x10b   :  { %v588_v57 = vpop.f32.mrf.mxu0  ;;  %v629_v58 = vpop.f32.mrf.mxu1 }
 0x10c   :  { %v671_v59 = vsub.f32 %v651_v49, %v658_v34  ;;  %v673_v4 = vsub.f32 %v653_v50, %v666_v35  ;;  %v652_v60 = vmax.f32 %v648_v51, 0.0  ;;  %v654_v61 = vmax.f32 %v650_v52, 0.0 }
 0x10e   :  { %v699_v3 = vmul.f32 %v686_v44, %v671_v59  ;;  %v701_v43 = vmul.f32 %v694_v45, %v673_v4  ;;  %v672_v5 = vsub.f32 %v652_v60, %v662_v12  ;;  %v674_v6 = vsub.f32 %v654_v61, %v670_v46 }
 0x110   :  { %v719_v9 = vmul.f32 %v706_v53, %v699_v3  ;;  %v721_v10 = vmul.f32 %v714_v54, %v701_v43  ;;  %v700_v11 = vmul.f32 %v690_v55, %v672_v5  ;;  %v702_v19 = vmul.f32 %v698_v56, %v674_v6 }
 0x112   :  { %v720_v13 = vmul.f32 %v710_v63, %v700_v11  ;;  %v722_v17 = vmul.f32 %v718_v0, %v702_v19  ;;  %v739_v14 = vadd.f32 %v726_v2, %v719_v9  ;;  %v741_v20 = vadd.f32 %v734_v1, %v721_v10 }
 0x114   :  { %v740_v21 = vadd.f32 %v730_v7, %v720_v13  ;;  %v742_v15 = vadd.f32 %v738_v8, %v722_v17  ;;  %743 = vst [vmem:[%s1854_s9] sm:$0xff] %v739_v14  ;;  %745 = vst [vmem:[%s1854_s9 + $0x10] sm:$0xff] %v741_v20  ;;  %v747_v18 = vpack.c.bf16 %v739_v14, %v739_v14 }
 0x115   :  { %v749_v22 = vpack.c.bf16 %v741_v20, %v741_v20 }
 0x116   :  { %744 = vst [vmem:[%s1854_s9 + $0x8] sm:$0xff] %v740_v21  ;;  %v748_v62 = vpack.c.bf16 %v740_v21, %v740_v21  ;;  %746 = vst [vmem:[%s1854_s9 + $0x18] sm:$0xff] %v742_v15  ;;  %v750_v16 = vpack.c.bf16 %v742_v15, %v742_v15 }
 0x118   :  { %1046 = vmatprep.mubr.bf16.mxu0 %v748_v62  ;;  %1086 = vmatprep.mubr.bf16.mxu1 %v750_v16 }
 0x119   :  { %1047 = vmatmul.mubr.bf16.vlgmr.msra.gmra.mxu0 %v747_v18  ;;  %1087 = vmatmul.mubr.bf16.vlgmr.msra.gmra.mxu1 %v749_v22 }
 0x1d9   :  { %v1216_v23 = vpop.f32.mrf.mxu0  ;;  %v1238_v24 = vpop.f32.mrf.mxu1 }
 0x1db   :  { %v1217_v26 = vpop.f32.mrf.mxu0  ;;  %v1239_v27 = vpop.f32.mrf.mxu1 }
 0x1dc   :  { %v1218_v29 = vadd.f32 %v1217_v26, %v1216_v23  ;;  %v1240_v32 = vadd.f32 %v1239_v27, %v1238_v24 }
 0x1dd   :  { %v1219_v28 = vpop.f32.mrf.mxu0  ;;  %v1241_v30 = vpop.f32.mrf.mxu1 }
 0x1de   :  { %v1049_v31 = vadd.f32 %v1218_v29, %v1167_v25 }
 0x1df   :  { %v1220_v33 = vpop.f32.mrf.mxu0  ;;  %v1242_v34 = vpop.f32.mrf.mxu1 }
 0x1e0   :  { %v1089_v35 = vadd.f32 %v1240_v32, %v1049_v31 }
 0x1e2   :  { %1094 = vst [vmem:[%s1856_s8] sm:$0xff] %v1089_v35 }

</bundles_post_ra>
